<compile_context>
chip_gen: v6e
topology: v6e:2x2x1
jax: 0.10.0
libtpu: 0.0.40
codegen_flags: <defaults>
</compile_context>

<pallas_src>
import functools

import numpy as np

import jax
import jax.numpy as jnp
from jax.experimental import pallas as pl
from jax.experimental.pallas import tpu as pltpu


# --------------------------------- kernel ------------------------------------

def inception_kernel(x_ref, wpre_ref, bpre_ref, wtap_ref, bout_ref, out_ref, *, L):
    """One row-tile of the fused Inception block.

    x_ref   : (R, Cin)        rows = Nb*L flattened (batch, length) positions
    wpre_ref: (Cin, Zw)       fused 1x1 weights, Zw = c1 + c2 + out_C
    bpre_ref: (1, Zw)
    wtap_ref: (5, Za, out_P)  stage-2 tap weights over za = [z | maxpool(x)]
                              (shifts -2..+2; branch concat, shortcut and the
                              maxpool-branch conv are block-placed inside)
    bout_ref: (1, out_P)
    out_ref : (R, out_P)      out_P = out_C padded up to a 128-lane multiple
    """
    R, Cin = x_ref.shape
    x = x_ref[...].astype(jnp.float32)                           # (R, Cin)

    # Row position within its batch element.  Valid because every row tile
    # starts at a batch-element boundary (Rb is a multiple of L).
    pos = jax.lax.broadcasted_iota(jnp.int32, (R, 1), 0) % L     # (R, 1)

    # Hoisted batch-boundary masks (shared by the maxpool selects and the tap
    # loop).  They zero the rows that pltpu.roll wraps around and the rows
    # whose shifted source would bleed into the neighbouring batch element.
    mask = {
        -2: pos >= 2,
        -1: pos >= 1,
        1: pos < (L - 1),
        2: pos < (L - 2),
    }

    # ---- stage 1: fused 1x1 convs  z = [t1 | t2 | shortcut] ----
    z = jnp.dot(x, wpre_ref[...],
                preferred_element_type=jnp.float32) + bpre_ref[...]

    # ---- branch 3: MaxPool1d(k=3, s=1, pad=1) via sublane rolls + masks ----
    left = jnp.where(mask[-1], pltpu.roll(x, shift=1, axis=0), -jnp.inf)   # x[r-1]
    right = jnp.where(mask[1], pltpu.roll(x, shift=(R - 1) % R, axis=0),   # x[r+1]
                      -jnp.inf)
    t3 = jnp.maximum(jnp.maximum(left, x), right)                # (R, Cin)

    # augmented stage-2 input: maxpool-branch taps are folded into the z taps
    za = jnp.concatenate([z, t3], axis=-1)                       # (R, Za)

    # ---- stage 2: roll-and-matmul over the 5 taps (shifts -2..+2) ----
    acc = bout_ref[...] + jnp.dot(za, wtap_ref[2],
                                  preferred_element_type=jnp.float32)
    for s in (-2, -1, 1, 2):                                     # static unroll
        zs = jnp.where(mask[s], pltpu.roll(za, shift=(-s) % R, axis=0), 0.0)
        acc = acc + jnp.dot(zs, wtap_ref[s + 2],
                            preferred_element_type=jnp.float32)

    out_ref[...] = acc.astype(out_ref.dtype)        # dense, unmasked 128-lane store


# -------------------------------- wrapper -------------------------------------

def _pick_batch_tile(N, L, bytes_per_row, vmem_budget_bytes, target_rows=2048):
    """Divisor-of-N row tile: fits the VMEM budget, prefers grid >= 2 (even),
    grows toward ~target_rows rows per grid step."""
    candidates = []
    for d in range(1, N + 1):
        if N % d:
            continue
        rb = d * L
        if rb % 8 != 0 and d != N:   # (8,128) sublane rule unless full-array block
            continue
        grid = N // d
        fits = rb * bytes_per_row <= vmem_budget_bytes
        candidates.append((d, rb, grid, fits))
    fitting = [c for c in candidates if c[3]]
    if fitting:
        best = max(fitting, key=lambda c: (c[2] >= 2, c[2] % 2 == 0,
                                           min(c[1], target_rows), -c[1]))
        return best[0]
    # nothing fits the budget: take the smallest legal tile
    return min(candidates, key=lambda c: c[1])[0]


def inception_forward(x_ncl, kernel_params):
    """x_ncl: (N, C_in, L) float32 (PyTorch Conv1d layout). Returns (N, out_C, L)."""
    N, Cin, L = x_ncl.shape
    wpre, bpre, wtap, bout, out_C = kernel_params
    Zw = wpre.shape[1]
    Za = wtap.shape[1]
    out_P = wtap.shape[2]

    # NCL -> flattened (N*L, Cin) row slab (channels on the lane axis).
    x_rows = jnp.transpose(x_ncl, (0, 2, 1)).reshape(N * L, Cin)

    # Row-tile selection: ~2048 rows per grid step, grid >= 2 when possible
    # (v7x: two TensorCores, 64 MiB VMEM), bounded by a conservative VMEM
    # budget covering double-buffered x/out tiles + live f32 intermediates.
    bytes_per_row = 4 * (2 * Cin + 2 * out_P + Zw + Cin + 3 * Za + out_P)
    vmem_budget = 16 * 1024 * 1024
    Nb = _pick_batch_tile(N, L, bytes_per_row, vmem_budget)
    Rb = Nb * L
    grid = (N // Nb,)

    weight_bytes = 4 * (wpre.size + bpre.size + wtap.size + bout.size)
    vmem_limit = int(min(56 << 20,
                         max(32 << 20, 2 * (Rb * bytes_per_row + weight_bytes))))

    in_specs = [
        pl.BlockSpec((Rb, Cin), lambda i: (i, 0)),        # x rows
        pl.BlockSpec(wpre.shape, lambda i: (0, 0)),       # weights stay resident
        pl.BlockSpec(bpre.shape, lambda i: (0, 0)),
        pl.BlockSpec(wtap.shape, lambda i: (0, 0, 0)),
        pl.BlockSpec(bout.shape, lambda i: (0, 0)),
    ]
    out_spec = pl.BlockSpec((Rb, out_P), lambda i: (i, 0))

    out_rows = pl.pallas_call(
        functools.partial(inception_kernel, L=L),
        out_shape=jax.ShapeDtypeStruct((N * L, out_P), x_ncl.dtype),
        grid=grid,
        in_specs=in_specs,
        out_specs=out_spec,
        compiler_params=pltpu.CompilerParams(
            dimension_semantics=("parallel",),
            vmem_limit_bytes=vmem_limit),
    )(x_rows, wpre, bpre, wtap, bout)

    # drop the lane padding and go back to the PyTorch NCL interface
    out = out_rows[:, :out_C].reshape(N, L, out_C)
    return jnp.transpose(out, (0, 2, 1))


# ------------------------ params (deterministic init) -------------------------

def init_torch_params(key, in_c, c1, c2, c3, out_C):
    ks = jax.random.split(key, 12)

    def w(k, shape):
        return 0.1 * jax.random.normal(k, shape, jnp.float32)

    # PyTorch Conv1d weight layout: (out_ch, in_ch, K)
    w1a_t, b1a = w(ks[0], (c1, in_c, 1)), w(ks[1], (c1,))
    w1b_t, b1b = w(ks[2], (c1, c1, 3)), w(ks[3], (c1,))
    w2a_t, b2a = w(ks[4], (c2, in_c, 1)), w(ks[5], (c2,))
    w2b_t, b2b = w(ks[6], (c2, c2, 5)), w(ks[7], (c2,))
    w3_t, b3 = w(ks[8], (c3, in_c, 3)), w(ks[9], (c3,))
    wsc_t = w(ks[10], (out_C, in_c, 1))   # shortcut conv, bias=False
    return (w1a_t, b1a, w1b_t, b1b, w2a_t, b2a, w2b_t, b2b, w3_t, b3, wsc_t)


def pack_kernel_params(torch_params, c1, c2, c3, out_C):
    """Build fused / block-placed weights host-side (zero runtime layout cost)."""
    (w1a_t, b1a, w1b_t, b1b, w2a_t, b2a, w2b_t, b2b, w3_t, b3, wsc_t) = (
        np.asarray(a) for a in torch_params)
    in_c = w1a_t.shape[1]
    Zw = c1 + c2 + out_C
    Za = Zw + in_c
    out_P = max(128, ((out_C + 127) // 128) * 128)   # lane-dense output stores

    # fused 1x1: z = [t1 | t2 | shortcut]
    wpre = np.zeros((in_c, Zw), np.float32)
    wpre[:, 0:c1] = w1a_t[:, :, 0].T
    wpre[:, c1:c1 + c2] = w2a_t[:, :, 0].T
    wpre[:, c1 + c2:] = wsc_t[:, :, 0].T
    bpre = np.zeros((1, Zw), np.float32)
    bpre[0, 0:c1] = b1a
    bpre[0, c1:c1 + c2] = b2a

    # stage-2 tap weights over za = [z | maxpool(x)], one (Za, out_P) block per
    # shift s in -2..+2.  Branch concat = block column placement, shortcut =
    # identity block at shift 0, maxpool-branch conv sits in the last in_c rows
    # (shifts -1..+1), columns >= out_C are zero lane padding.
    wtap = np.zeros((5, Za, out_P), np.float32)
    for s in (-1, 0, 1):                                  # branch 1, k=3
        wtap[s + 2, 0:c1, 0:c1] = w1b_t[:, :, s + 1].T
    for s in (-2, -1, 0, 1, 2):                           # branch 2, k=5
        wtap[s + 2, c1:c1 + c2, c1:c1 + c2] = w2b_t[:, :, s + 2].T
    wtap[2, c1 + c2:Zw, 0:out_C] = np.eye(out_C, dtype=np.float32)  # shortcut
    for s in (-1, 0, 1):                                  # branch 3, k=3
        wtap[s + 2, Zw:Za, c1 + c2:c1 + c2 + c3] = w3_t[:, :, s + 1].T

    bout = np.zeros((1, out_P), np.float32)
    bout[0, 0:c1] = b1b
    bout[0, c1:c1 + c2] = b2b
    bout[0, c1 + c2:c1 + c2 + c3] = b3

    packed = tuple(jnp.asarray(a) for a in (wpre, bpre, wtap, bout))
    return packed + (out_C,)


# ------------------------------ pure-JAX reference ----------------------------

def reference_forward(x_ncl, torch_params):
    (w1a_t, b1a, w1b_t, b1b, w2a_t, b2a, w2b_t, b2b, w3_t, b3, wsc_t) = torch_params

    def conv(x, w_, b_, pad):
        y = jax.lax.conv_general_dilated(
            x, w_, window_strides=(1,), padding=[(pad, pad)],
            dimension_numbers=('NCH', 'OIH', 'NCH'))
        if b_ is not None:
            y = y + b_[None, :, None]
        return y

    p1 = conv(conv(x_ncl, w1a_t, b1a, 0), w1b_t, b1b, 1)
    p2 = conv(conv(x_ncl, w2a_t, b2a, 0), w2b_t, b2b, 2)
    mp = jax.lax.reduce_window(x_ncl, -jnp.inf, jax.lax.max,
                               (1, 1, 3), (1, 1, 1), ((0, 0), (0, 0), (1, 1)))
    p3 = conv(mp, w3_t, b3, 1)
    out = jnp.concatenate([p1, p2, p3], axis=1)
    return out + conv(x_ncl, wsc_t, None, 0)


# ----------------------------------- main --------------------------------------

if __name__ == "__main__":
    # Small shapes consistent with the module. The residual add requires
    # out_C == c1 + c2 + c3; in_c != out_C so the shortcut 1x1 conv is exercised.
    N, in_c, L = 2, 4, 16
    c1, c2, c3 = 8, 8, 16
    out_C = c1 + c2 + c3

    key = jax.random.PRNGKey(0)
    kx, kp = jax.random.split(key)
    x = jax.random.normal(kx, (N, in_c, L), jnp.float32)   # PyTorch NCL layout

    torch_params = init_torch_params(kp, in_c, c1, c2, c3, out_C)
    kernel_params = pack_kernel_params(torch_params, c1, c2, c3, out_C)

    out = inception_forward(x, kernel_params)
    out = jax.block_until_ready(out)

    ref = reference_forward(x, torch_params)
    assert out.shape == (N, out_C, L), out.shape
    assert jnp.allclose(out, ref, atol=1e-4, rtol=1e-4), \
        float(jnp.max(jnp.abs(out - ref)))

    print("KERNEL_OK")
</pallas_src>

<mosaic_0001>
module attributes {stable_mosaic.version = 11 : i64} {
  func.func @inception_kernel(%arg0: i32, %arg1: memref<16x4xf32, #tpu.memory_space<vmem>>, %arg2: memref<4x48xf32, #tpu.memory_space<vmem>>, %arg3: memref<1x48xf32, #tpu.memory_space<vmem>>, %arg4: memref<5x52x128xf32, #tpu.memory_space<vmem>>, %arg5: memref<1x128xf32, #tpu.memory_space<vmem>>, %arg6: memref<16x128xf32, #tpu.memory_space<vmem>>) attributes {dimension_semantics = [#tpu.dimension_semantics<parallel>], iteration_bounds = array<i64: 2>, scalar_prefetch = 0 : i64, scratch_operands = 0 : i64, tpu.core_type = #tpu.core_type<tc>, window_params = [{transform_indices = @transform_0, window_bounds = array<i64: 16, 4>}, {pipeline_mode = #tpu.pipeline_mode<synchronous>, transform_indices = @transform_1, window_bounds = array<i64: 4, 48>}, {pipeline_mode = #tpu.pipeline_mode<synchronous>, transform_indices = @transform_2, window_bounds = array<i64: 1, 48>}, {pipeline_mode = #tpu.pipeline_mode<synchronous>, transform_indices = @transform_3, window_bounds = array<i64: 5, 52, 128>}, {pipeline_mode = #tpu.pipeline_mode<synchronous>, transform_indices = @transform_4, window_bounds = array<i64: 1, 128>}, {transform_indices = @transform_5, window_bounds = array<i64: 16, 128>}]} {
    %c0 = arith.constant 0 : index
    %c0_0 = arith.constant 0 : index
    %0 = vector.load %arg1[%c0, %c0_0] : memref<16x4xf32, #tpu.memory_space<vmem>>, vector<16x4xf32>
    %1 = tpu.iota {dimensions = array<i32: 0>} : vector<16x1xi32>
    %c16_i32 = arith.constant 16 : i32
    %c0_i32 = arith.constant 0 : i32
    %2 = arith.cmpi eq, %c16_i32, %c0_i32 : i32
    %c1_i32 = arith.constant 1 : i32
    %3 = arith.select %2, %c1_i32, %c16_i32 : i32
    %4 = vector.broadcast %3 : i32 to vector<16x1xi32>
    %5 = arith.remsi %1, %4 : vector<16x1xi32>
    %c0_i32_1 = arith.constant 0 : i32
    %6 = vector.broadcast %c0_i32_1 : i32 to vector<16x1xi32>
    %7 = arith.cmpi ne, %5, %6 : vector<16x1xi32>
    %c0_i32_2 = arith.constant 0 : i32
    %8 = vector.broadcast %c0_i32_2 : i32 to vector<16x1xi32>
    %9 = arith.cmpi slt, %5, %8 : vector<16x1xi32>
    %c0_i32_3 = arith.constant 0 : i32
    %10 = arith.cmpi slt, %3, %c0_i32_3 : i32
    %11 = vector.broadcast %10 : i1 to vector<16x1xi1>
    %12 = vector.broadcast %11 : vector<16x1xi1> to vector<16x1xi1>
    %13 = arith.xori %9, %12 : vector<16x1xi1>
    %14 = arith.andi %13, %7 : vector<16x1xi1>
    %15 = vector.broadcast %3 : i32 to vector<16x1xi32>
    %16 = arith.addi %5, %15 : vector<16x1xi32>
    %17 = arith.select %14, %16, %5 : vector<16x1xi1>, vector<16x1xi32>
    %c2_i32 = arith.constant 2 : i32
    %18 = vector.broadcast %c2_i32 : i32 to vector<16x1xi32>
    %19 = arith.cmpi sge, %17, %18 : vector<16x1xi32>
    %c1_i32_4 = arith.constant 1 : i32
    %20 = vector.broadcast %c1_i32_4 : i32 to vector<16x1xi32>
    %21 = arith.cmpi sge, %17, %20 : vector<16x1xi32>
    %c15_i32 = arith.constant 15 : i32
    %22 = vector.broadcast %c15_i32 : i32 to vector<16x1xi32>
    %23 = arith.cmpi slt, %17, %22 : vector<16x1xi32>
    %c14_i32 = arith.constant 14 : i32
    %24 = vector.broadcast %c14_i32 : i32 to vector<16x1xi32>
    %25 = arith.cmpi slt, %17, %24 : vector<16x1xi32>
    %c0_5 = arith.constant 0 : index
    %c0_6 = arith.constant 0 : index
    %26 = vector.load %arg2[%c0_5, %c0_6] : memref<4x48xf32, #tpu.memory_space<vmem>>, vector<4x48xf32>
    %cst = arith.constant dense<0.000000e+00> : vector<16x48xf32>
    %27 = tpu.matmul %0, %26, %cst {dimension_numbers = #tpu.dot_dimension_numbers<[1], [0], [0], [1], [0, 0, 1, 1], [], []>} : vector<16x4xf32>, vector<4x48xf32>, vector<16x48xf32> -> vector<16x48xf32>
    %c0_7 = arith.constant 0 : index
    %c0_8 = arith.constant 0 : index
    %28 = vector.load %arg3[%c0_7, %c0_8] : memref<1x48xf32, #tpu.memory_space<vmem>>, vector<1x48xf32>
    %29 = vector.broadcast %28 : vector<1x48xf32> to vector<16x48xf32>
    %30 = arith.addf %27, %29 : vector<16x48xf32>
    %c1_i32_9 = arith.constant 1 : i32
    %31 = tpu.dynamic_rotate %0 by %c1_i32_9 dim 0 : vector<16x4xf32>, i32 -> vector<16x4xf32>
    %cst_10 = arith.constant 0xFF800000 : f32
    %32 = vector.shape_cast %21 : vector<16x1xi1> to vector<16x1xi1>
    %33 = vector.broadcast %32 : vector<16x1xi1> to vector<16x4xi1>
    %34 = vector.broadcast %cst_10 : f32 to vector<16x4xf32>
    %35 = arith.select %33, %31, %34 : vector<16x4xi1>, vector<16x4xf32>
    %c15_i32_11 = arith.constant 15 : i32
    %36 = tpu.dynamic_rotate %0 by %c15_i32_11 dim 0 : vector<16x4xf32>, i32 -> vector<16x4xf32>
    %cst_12 = arith.constant 0xFF800000 : f32
    %37 = vector.shape_cast %23 : vector<16x1xi1> to vector<16x1xi1>
    %38 = vector.broadcast %37 : vector<16x1xi1> to vector<16x4xi1>
    %39 = vector.broadcast %cst_12 : f32 to vector<16x4xf32>
    %40 = arith.select %38, %36, %39 : vector<16x4xi1>, vector<16x4xf32>
    %41 = arith.maximumf %35, %0 : vector<16x4xf32>
    %42 = arith.maximumf %41, %40 : vector<16x4xf32>
    %43 = tpu.concatenate %30, %42 in 1 : vector<16x48xf32>, vector<16x4xf32> -> vector<16x52xf32>
    %c0_13 = arith.constant 0 : index
    %c0_14 = arith.constant 0 : index
    %44 = vector.load %arg5[%c0_13, %c0_14] : memref<1x128xf32, #tpu.memory_space<vmem>>, vector<1x128xf32>
    %c2 = arith.constant 2 : index
    %c0_15 = arith.constant 0 : index
    %c0_16 = arith.constant 0 : index
    %45 = vector.load %arg4[%c2, %c0_15, %c0_16] : memref<5x52x128xf32, #tpu.memory_space<vmem>>, vector<1x52x128xf32>
    %46 = vector.shape_cast %45 : vector<1x52x128xf32> to vector<52x128xf32>
    %cst_17 = arith.constant dense<0.000000e+00> : vector<16x128xf32>
    %47 = tpu.matmul %43, %46, %cst_17 {dimension_numbers = #tpu.dot_dimension_numbers<[1], [0], [0], [1], [0, 0, 1, 1], [], []>} : vector<16x52xf32>, vector<52x128xf32>, vector<16x128xf32> -> vector<16x128xf32>
    %48 = vector.broadcast %44 : vector<1x128xf32> to vector<16x128xf32>
    %49 = arith.addf %48, %47 : vector<16x128xf32>
    %c2_i32_18 = arith.constant 2 : i32
    %50 = tpu.dynamic_rotate %43 by %c2_i32_18 dim 0 : vector<16x52xf32>, i32 -> vector<16x52xf32>
    %cst_19 = arith.constant 0.000000e+00 : f32
    %51 = vector.shape_cast %19 : vector<16x1xi1> to vector<16x1xi1>
    %52 = vector.broadcast %51 : vector<16x1xi1> to vector<16x52xi1>
    %53 = vector.broadcast %cst_19 : f32 to vector<16x52xf32>
    %54 = arith.select %52, %50, %53 : vector<16x52xi1>, vector<16x52xf32>
    %c0_20 = arith.constant 0 : index
    %c0_21 = arith.constant 0 : index
    %c0_22 = arith.constant 0 : index
    %55 = vector.load %arg4[%c0_20, %c0_21, %c0_22] : memref<5x52x128xf32, #tpu.memory_space<vmem>>, vector<1x52x128xf32>
    %56 = vector.shape_cast %55 : vector<1x52x128xf32> to vector<52x128xf32>
    %cst_23 = arith.constant dense<0.000000e+00> : vector<16x128xf32>
    %57 = tpu.matmul %54, %56, %cst_23 {dimension_numbers = #tpu.dot_dimension_numbers<[1], [0], [0], [1], [0, 0, 1, 1], [], []>} : vector<16x52xf32>, vector<52x128xf32>, vector<16x128xf32> -> vector<16x128xf32>
    %58 = arith.addf %49, %57 : vector<16x128xf32>
    %c1_i32_24 = arith.constant 1 : i32
    %59 = tpu.dynamic_rotate %43 by %c1_i32_24 dim 0 : vector<16x52xf32>, i32 -> vector<16x52xf32>
    %cst_25 = arith.constant 0.000000e+00 : f32
    %60 = vector.shape_cast %21 : vector<16x1xi1> to vector<16x1xi1>
    %61 = vector.broadcast %60 : vector<16x1xi1> to vector<16x52xi1>
    %62 = vector.broadcast %cst_25 : f32 to vector<16x52xf32>
    %63 = arith.select %61, %59, %62 : vector<16x52xi1>, vector<16x52xf32>
    %c1 = arith.constant 1 : index
    %c0_26 = arith.constant 0 : index
    %c0_27 = arith.constant 0 : index
    %64 = vector.load %arg4[%c1, %c0_26, %c0_27] : memref<5x52x128xf32, #tpu.memory_space<vmem>>, vector<1x52x128xf32>
    %65 = vector.shape_cast %64 : vector<1x52x128xf32> to vector<52x128xf32>
    %cst_28 = arith.constant dense<0.000000e+00> : vector<16x128xf32>
    %66 = tpu.matmul %63, %65, %cst_28 {dimension_numbers = #tpu.dot_dimension_numbers<[1], [0], [0], [1], [0, 0, 1, 1], [], []>} : vector<16x52xf32>, vector<52x128xf32>, vector<16x128xf32> -> vector<16x128xf32>
    %67 = arith.addf %58, %66 : vector<16x128xf32>
    %c15_i32_29 = arith.constant 15 : i32
    %68 = tpu.dynamic_rotate %43 by %c15_i32_29 dim 0 : vector<16x52xf32>, i32 -> vector<16x52xf32>
    %cst_30 = arith.constant 0.000000e+00 : f32
    %69 = vector.shape_cast %23 : vector<16x1xi1> to vector<16x1xi1>
    %70 = vector.broadcast %69 : vector<16x1xi1> to vector<16x52xi1>
    %71 = vector.broadcast %cst_30 : f32 to vector<16x52xf32>
    %72 = arith.select %70, %68, %71 : vector<16x52xi1>, vector<16x52xf32>
    %c3 = arith.constant 3 : index
    %c0_31 = arith.constant 0 : index
    %c0_32 = arith.constant 0 : index
    %73 = vector.load %arg4[%c3, %c0_31, %c0_32] : memref<5x52x128xf32, #tpu.memory_space<vmem>>, vector<1x52x128xf32>
    %74 = vector.shape_cast %73 : vector<1x52x128xf32> to vector<52x128xf32>
    %cst_33 = arith.constant dense<0.000000e+00> : vector<16x128xf32>
    %75 = tpu.matmul %72, %74, %cst_33 {dimension_numbers = #tpu.dot_dimension_numbers<[1], [0], [0], [1], [0, 0, 1, 1], [], []>} : vector<16x52xf32>, vector<52x128xf32>, vector<16x128xf32> -> vector<16x128xf32>
    %76 = arith.addf %67, %75 : vector<16x128xf32>
    %c14_i32_34 = arith.constant 14 : i32
    %77 = tpu.dynamic_rotate %43 by %c14_i32_34 dim 0 : vector<16x52xf32>, i32 -> vector<16x52xf32>
    %cst_35 = arith.constant 0.000000e+00 : f32
    %78 = vector.shape_cast %25 : vector<16x1xi1> to vector<16x1xi1>
    %79 = vector.broadcast %78 : vector<16x1xi1> to vector<16x52xi1>
    %80 = vector.broadcast %cst_35 : f32 to vector<16x52xf32>
    %81 = arith.select %79, %77, %80 : vector<16x52xi1>, vector<16x52xf32>
    %c4 = arith.constant 4 : index
    %c0_36 = arith.constant 0 : index
    %c0_37 = arith.constant 0 : index
    %82 = vector.load %arg4[%c4, %c0_36, %c0_37] : memref<5x52x128xf32, #tpu.memory_space<vmem>>, vector<1x52x128xf32>
    %83 = vector.shape_cast %82 : vector<1x52x128xf32> to vector<52x128xf32>
    %cst_38 = arith.constant dense<0.000000e+00> : vector<16x128xf32>
    %84 = tpu.matmul %81, %83, %cst_38 {dimension_numbers = #tpu.dot_dimension_numbers<[1], [0], [0], [1], [0, 0, 1, 1], [], []>} : vector<16x52xf32>, vector<52x128xf32>, vector<16x128xf32> -> vector<16x128xf32>
    %85 = arith.addf %76, %84 : vector<16x128xf32>
    %c0_39 = arith.constant 0 : index
    %c0_40 = arith.constant 0 : index
    %86 = vector.load %arg6[%c0_39, %c0_40] : memref<16x128xf32, #tpu.memory_space<vmem>>, vector<16x128xf32>
    tpu.vector_store %arg6[%c0_39, %c0_40], %85 {strides = array<i32>} : memref<16x128xf32, #tpu.memory_space<vmem>>, vector<16x128xf32>,
    return
  }
  func.func @transform_0(%arg0: i32) -> (i32, i32) {
    %c0_i32 = arith.constant 0 : i32
    %c0_i32_0 = arith.constant 0 : i32
    return %arg0, %c0_i32 : i32, i32
  }
  func.func @transform_1(%arg0: i32) -> (i32, i32) {
    %c0_i32 = arith.constant 0 : i32
    %c0_i32_0 = arith.constant 0 : i32
    %c0_i32_1 = arith.constant 0 : i32
    return %c0_i32, %c0_i32_0 : i32, i32
  }
  func.func @transform_2(%arg0: i32) -> (i32, i32) {
    %c0_i32 = arith.constant 0 : i32
    %c0_i32_0 = arith.constant 0 : i32
    %c0_i32_1 = arith.constant 0 : i32
    return %c0_i32, %c0_i32_0 : i32, i32
  }
  func.func @transform_3(%arg0: i32) -> (i32, i32, i32) {
    %c0_i32 = arith.constant 0 : i32
    %c0_i32_0 = arith.constant 0 : i32
    %c0_i32_1 = arith.constant 0 : i32
    %c0_i32_2 = arith.constant 0 : i32
    return %c0_i32, %c0_i32_0, %c0_i32_1 : i32, i32, i32
  }
  func.func @transform_4(%arg0: i32) -> (i32, i32) {
    %c0_i32 = arith.constant 0 : i32
    %c0_i32_0 = arith.constant 0 : i32
    %c0_i32_1 = arith.constant 0 : i32
    return %c0_i32, %c0_i32_0 : i32, i32
  }
  func.func @transform_5(%arg0: i32) -> (i32, i32) {
    %c0_i32 = arith.constant 0 : i32
    %c0_i32_0 = arith.constant 0 : i32
    return %arg0, %c0_i32 : i32, i32
  }
}

</mosaic_0001>

<bundles_post_ra>
// kernel: tpu_custom_call.1
= control target key start
LH: loop header
LB: loop body
LE: loop exit
PB: predicated region body
PF: predicated region fallthrough
CT: control target
= control target key end

     0   :  { %10 = vsyncpa [#allocation3], 0  ;;  %s1598_s0 = inlined_call_operand.vmem [shape: f32[32,4], index: 0, kind: input, shape index: {}]   ;;  %s1599_s1 = inlined_call_operand.vmem [shape: f32[4,48], index: 1, kind: input, shape index: {}]   ;;  %s1600_s2 = inlined_call_operand.vmem [shape: f32[1,48], index: 2, kind: input, shape index: {}]   ;;  %s1601_s3 = inlined_call_operand.hbm [shape: f32[5,52,128], index: 3, kind: input, shape index: {}]   ;;  %s1602_s4 = inlined_call_operand.vmem [shape: f32[1,128], index: 4, kind: input, shape index: {}]   ;;  %s1603_s5 = inlined_call_operand.hbm [shape: f32[32,128], index: 5, kind: output, shape index: {}]  }
   0x1   :  { %11 = vsyncpa [#allocation4], 0 }
   0x2   :  { %13 = vsyncpa [#allocation4 + $0x1], 0  ;;  %s1367_s18 = smov 0   ;;  %s1369_s19 = smov 0  }
   0x3   :  { %s1371_s20 = smov 0   ;;  %s1373_s21 = smov 0  }
   0x4 LB: > { %s1388_s22 = sadd.s32 4294967295, %s1328_s21   ;;  %s1010_s23 = sadd.s32 4294967294, %s1328_s21   ;;  %s1328_s21 = sphi %s1373_s21, %s1617_s21   ;;  %s1324_s20 = sphi %s1371_s20, %s1616_s20   ;;  %s1320_s19 = sphi %s1369_s19, %s1615_s19   ;;  %s1316_s18 = sphi %s1367_s18, %s1614_s18  }
   0x5   : > { %s1392_s24 = sadd.s32 1, %s1328_s21   ;;  %s136_s25 = sadd.s32 1, %s1324_s20 }
   0x6   : > { %s133_s26 = ssub.s32 %s1328_s21, %s1392_s24  ;;  %p146_p0 = scmp.ne.s32.totalorder %s1324_s20, %s1320_s19 }
   0x7   : > { %p134_p1 = scmp.eq.s32.totalorder %s133_s26, 0  ;;  %p147_p2 = scmp.eq.s32.totalorder %s1388_s22, 1 }
   0x8   : > { %p152_p3 = scmp.ne.s32.totalorder %s1320_s19, %s1316_s18  ;;  %p153_p4 = scmp.eq.s32.totalorder %s1010_s23, 1 }
   0x9   : > { %s1403_s27 = scalar_select %p134_p1, %s1324_s20, %s136_s25  }
   0xa   : > { %p1405_p5 = por %p147_p2, %p146_p0  ;;  %p1409_p6 = por %p153_p4, %p152_p3 }
   0xb   : > { %p1011_p7 = scmp.ge.s32.totalorder %s1328_s21, 1  ;;  %p160_p8 = scmp.lt.s32.totalorder %s1328_s21, 3 }
   0xc   : > { %s1605_s29 = scalar_select %p1409_p6, 1, 0 }
   0xd   : > { %p1197_p9 = scmp.eq.s32.totalorder %s1388_s22, 0  ;;  %p1416_p10 = pnand %p1011_p7, %p160_p8 }
   0xe   : > { %s1330_s6 = smov [#allocation2]  }
   0xf   : > { %s178_s7 = sshll.u32 %s1330_s6, 4  ;;  %p1189_p11 = pneg %p1416_p10  ;;  %s179_s7 = int_to_ptr.vmem [resolvable:$true] %s178_s7 }
  0x10   : > { %s1249_s8 = scalar_lea.vmem %s179_s7, 4480  ;;  %p1257_p3 = scmp.lt.s32.totalorder %s179_s7, %s179_s7 }
  0x11   : > { %p1190_p12 = pnand %p1197_p9, %p1189_p11  ;;  %p1250_p0 = scmp.ne.s32.totalorder %s179_s7, %s1249_s8 }
  0x12   : > { %p1258_p4 = scmp.lt.s32.totalorder %s1249_s8, %s1249_s8 }
  0x13   : > { %p1240_p13 = pneg %p1190_p12 }
  0x14   : > { %p1259_p6 = por %p1258_p4, %p1257_p3 }
  0x15   : > { %p1252_p1 = pnand %p1250_p0, %p1240_p13 }
  0x17   : > { %p1253_p2 = pneg %p1252_p1 }
  0x19   : > { %p1260_p7 = pnand %p1259_p6, %p1253_p2 }
  0x1b   : > { %1263 = shalt.err (!%p1260_p7)
}
  0x1c   : > { %s1331_s9 = smov 128   ;;  %s1332_s10 = smov 8  }
  0x1d   : > { %1192 = dma.hbm_to_vmem [thread:$0]  (!%p1190_p12), %s1601_s3, 4480, %s179_s7, [#allocation3], %s1331_s9, %s1331_s9, %s1332_s10  }
  0x1e   : > { %206 = sbr.rel (%p1416_p10) target bundleno = 484 (0x1e4), region = 40 }
  0x23   : > { %1307 = dma.done.wait (%p1197_p9), [#allocation3], 4480  }
  0x24   : > { %1309 = vsyncadd (%p1197_p9), [#allocation3], 4294962816  ;;  %s1017_s13 = sshll.u32 %s1388_s22, 1  ;;  %v243_v0 = vlaneseq  ;;  %vm293_vm0 = vcmask 1043456   ;;  %vm286_vm1 = vcmask 31744   ;;  %v416_v14 = vld [vmem:[#allocation2 + $0x98] sm:$0xff] }
  0x25   : > { %p235_p6 = scmp.lt.s32.totalorder %s1017_s13, 3  ;;  %v278_v5 = vld [vmem:[%s1599_s1] sm:$0xf]  ;;  %v528_v15 = vld [vmem:[#allocation2 + $0x30] sm:$0xf]  ;;  %v527_v20 = vld [vmem:[#allocation2 + $0x28] sm:$0xff] }
  0x26   : > { %v1434_v1 = vshrl.u32 %v243_v0, 7  ;;  %1093 = vmatprep.subr.msk.mxu0 %vm293_vm0, %v278_v5  ;;  %v417_v13 = vld [vmem:[#allocation2 + $0xa0] sm:$0xf]  ;;  %v415_v23 = vld [vmem:[#allocation2 + $0x90] sm:$0xff]  ;;  %v414_v27 = vld [vmem:[#allocation2 + $0x88] sm:$0xff]  ;;  %s1333_s26 = smov 48  }
  0x27   : > { %s1619_s13 = smov (!%p235_p6, %s1017_s13), 3  ;;  %1094 = vmatpush3.msk.msra.mxu0 %vm293_vm0, %v278_v5  ;;  %1098 = vmatprep.subr.msk.mxu1 %vm293_vm0, %v417_v13  ;;  %v413_v30 = vld [vmem:[#allocation2 + $0x80] sm:$0xff]  ;;  %v412_v32 = vld [vmem:[#allocation2 + $0x78] sm:$0xff]  ;;  %v411_v34 = vld [vmem:[#allocation2 + $0x70] sm:$0xff]  ;;  %vm406_vm6 = vcmask 392192   ;;  %vm418_vm7 = vcmask 424960  }
  0x28   : > { %v250_v2 = vand.u32 15, %v1434_v1  ;;  %v1438_v3 = vadd.s32 8, %v1434_v1  ;;  %s1018_s14 = sshll.u32 %s1619_s13, 3  ;;  %vm374_vm2 = vcmp.lt.s32.totalorder %v1434_v1, 1  ;;  %vm385_vm4 = vcmp.lt.s32.totalorder %v1434_v1, 7  ;;  %1099 = vmatpush3.msk.msra.mxu1 %vm293_vm0, %v417_v13  ;;  %1115 = vmatprep.subr.msk.mxu0 %vm293_vm0, %v528_v15  ;;  %v526_v31 = vld [vmem:[#allocation2 + $0x20] sm:$0xff] }
  0x29   : > { %s238_s17 = scalar_lea.vmem %s1598_s0, %s1018_s14  ;;  %1100 = vmatprep.subr.mxu1 %v416_v14  ;;  %v525_v33 = vld [vmem:[#allocation2 + $0x18] sm:$0xff]  ;;  %v524_v35 = vld [vmem:[#allocation2 + $0x10] sm:$0xff]  ;;  %v523_v36 = vld [vmem:[#allocation2 + $0x8] sm:$0xff]  ;;  %vm513_vm9 = vcmp.lt.s32.totalorder %v1434_v1, 2  ;;  %vm817_vm10 = vcmp.lt.s32.totalorder %v1434_v1, 6  ;;  %s231_s9 = sand.u32 1, %s1320_s19  }
  0x2a   : > { %v257_v4 = vand.u32 15, %v1438_v3  ;;  %v241_v6 = vld [vmem:[%s238_s17] sm:$0xff]  ;;  %v242_v7 = vld [vmem:[%s238_s17 + $0x8] sm:$0xff]  ;;  %vm1450_vm3 = vcmp.ge.s32.totalorder %v250_v2, 1  ;;  %1101 = vmatpush3.msra.mxu1 %v416_v14  ;;  %v728_v39 = vld [vmem:[#allocation2 + $0xd8] sm:$0xf] }
  0x2b   : > { %1095 = vmatprep.mubr.msk.f32.mxu0 %vm286_vm1, %v241_v6  ;;  %v372_v9 = vrot.slane %v241_v6, 7  ;;  %v373_v10 = vrot.slane %v242_v7, 7  ;;  %v383_v11 = vrot.slane %v241_v6, 1  ;;  %v384_v12 = vrot.slane %v242_v7, 1  ;;  %1102 = vmatprep.subr.mxu1 %v415_v23  ;;  %v628_v37 = vld [vmem:[#allocation2 + $0x68] sm:$0xf] }
  0x2c   : > { %1096 = vmatmul.mubr.msk.f32.vlgmr.msra.gmra.mxu0 %vm286_vm1, %v242_v7  ;;  %vm1464_vm5 = vcmp.lt.s32.totalorder %v257_v4, 15  ;;  %1103 = vmatpush3.msra.mxu1 %v415_v23  ;;  %v522_v38 = vld [vmem:[#allocation2] sm:$0xff]  ;;  %vm1492_vm8 = vcmp.ge.s32.totalorder %v250_v2, 2  ;;  %v626_v56 = vld [vmem:[#allocation2 + $0x58] sm:$0xff]  ;;  %v625_v61 = vld [vmem:[#allocation2 + $0x50] sm:$0xff]  ;;  %vm277_vm11 = vcmp.lt.s32.totalorder %v257_v4, 14 }
  0x2d   : > { %v376_v16 = vsel %vm374_vm2, %v373_v10, %v372_v9  ;;  %v375_v18 = vsel %vm374_vm2, %v372_v9, %v373_v10  ;;  %v387_v19 = vsel %vm385_vm4, %v384_v12, %v383_v11  ;;  %v386_v22 = vsel %vm385_vm4, %v383_v11, %v384_v12  ;;  %1116 = vmatpush3.msk.msra.mxu0 %vm293_vm0, %v528_v15  ;;  %v1019_v41 = vld [vmem:[%s1600_s2] ss:$0 sm:$0xff]  ;;  %v727_v63 = vld [vmem:[#allocation2 + $0xd0] sm:$0xff]  ;;  %v624_v5 = vld [vmem:[#allocation2 + $0x48] sm:$0xff]  ;;  %s1016_s10 = sshll.u32 %s231_s9, 4  ;;  %s1044_s13 = sshll.u32 %s1388_s22, 8 }
  0x2e   : > { %v381_v21 = vsel %vm1450_vm3, %v376_v16, -inf  ;;  %v395_v25 = vmax.f32 %v375_v18, %v242_v7  ;;  %v393_v26 = vsel %vm1464_vm5, %v387_v19, -inf  ;;  %1117 = vmatprep.subr.mxu0 %v527_v20  ;;  %1104 = vmatprep.subr.mxu1 %v414_v27  ;;  %v627_v52 = vld [vmem:[#allocation2 + $0x60] sm:$0xff]  ;;  %v622_v9 = vld [vmem:[#allocation2 + $0x38] sm:$0xff]  ;;  %v723_v11 = vld [vmem:[#allocation2 + $0xb0] sm:$0xff]  ;;  %s233_s11 = scalar_lea.vmem [#allocation5], %s1016_s10  ;;  %s1556_s16 = scalar_lea.hbm %s1603_s5, %s1044_s13 }
  0x2f   : > { %v394_v24 = vmax.f32 %v381_v21, %v241_v6  ;;  %1118 = vmatpush3.msra.mxu0 %v527_v20  ;;  %1105 = vmatpush3.msra.mxu1 %v414_v27  ;;  %v726_v6 = vld [vmem:[#allocation2 + $0xc8] sm:$0xff]  ;;  %v623_v7 = vld [vmem:[#allocation2 + $0x40] sm:$0xff]  ;;  %v724_v10 = vld [vmem:[#allocation2 + $0xb8] sm:$0xff]  ;;  %s936_s12 = sshll.u32 %s233_s11, 4  ;;  %s1558_s17 = scalar_lea.sflag [#allocation4], %s231_s9  ;;  %s1551_s12 = int_to_ptr.vmem [resolvable:$true] %s936_s12 }
  0x30   : > { %v397_v29 = vmax.f32 %v395_v25, %v393_v26  ;;  %1106 = vmatprep.subr.mxu1 %v413_v30  ;;  %1119 = vmatprep.subr.mxu0 %v526_v31  ;;  %v725_v8 = vld [vmem:[#allocation2 + $0xc0] sm:$0xff]  ;;  %v833_v13 = vld [vmem:[#allocation2 + $0x110] sm:$0xf]  ;;  %v722_v16 = vld [vmem:[#allocation2 + $0xa8] sm:$0xff]  ;;  %s1264_s22 = scalar_lea.vmem %s1551_s12, 256  ;;  %s1334_s23 = smov [#allocation5]  }
  0x31   : > { %v396_v28 = vmax.f32 %v394_v24, %v386_v22  ;;  %1107 = vmatpush3.msra.mxu1 %v413_v30  ;;  %1120 = vmatpush3.msra.mxu0 %v526_v31  ;;  %v832_v18 = vld [vmem:[#allocation2 + $0x108] sm:$0xff]  ;;  %v831_v21 = vld [vmem:[#allocation2 + $0x100] sm:$0xff]  ;;  %v830_v23 = vld [vmem:[#allocation2 + $0xf8] sm:$0xff]  ;;  %p1265_p8 = scmp.ne.s32.totalorder %s1551_s12, %s1264_s22  ;;  %s1268_s25 = sshll.u32 %s1334_s23, 4  ;;  %s1269_s25 = int_to_ptr.vmem [resolvable:$false] %s1268_s25 }
  0x32   : > { %1108 = vmatprep.subr.mxu1 %v412_v32  ;;  %1121 = vmatprep.subr.mxu0 %v525_v33  ;;  %v829_v24 = vld [vmem:[#allocation2 + $0xf0] sm:$0xff]  ;;  %v828_v25 = vld [vmem:[#allocation2 + $0xe8] sm:$0xff]  ;;  %v827_v26 = vld [vmem:[#allocation2 + $0xe0] sm:$0xff]  ;;  %p1271_p11 = scmp.lt.s32.totalorder %s1551_s12, %s1269_s25 }
  0x33   : > { %400 = vrot.lane.b32.xlu0 %v396_v28, %s1333_s26  ;;  %1109 = vmatpush3.msra.mxu1 %v412_v32  ;;  %v1026_v30 = vld [vmem:[%s1602_s4] ss:$0 sm:$0xff]  ;;  %p1266_p9 = pnand %p1265_p8, %p1405_p5 }
  0x34   : > { %1122 = vmatpush3.msra.mxu0 %v525_v33  ;;  %1110 = vmatprep.subr.mxu1 %v411_v34 }
  0x35   : > { %1123 = vmatprep.subr.mxu0 %v524_v35  ;;  %1111 = vmatpush3.msra.mxu1 %v411_v34  ;;  %p1267_p10 = pneg %p1266_p9 }
  0x36   : > { %1124 = vmatpush3.msra.mxu0 %v524_v35  ;;  %1132 = vmatprep.subr.msk.mxu1 %vm293_vm0, %v628_v37 }
  0x37   : > { %402 = vrot.lane.b32.xlu0 %v397_v29, %s1333_s26  ;;  %1125 = vmatprep.subr.mxu0 %v523_v36  ;;  %s1270_s26 = scalar_lea.vmem %s1269_s25, 512 }
  0x38   : > { %1126 = vmatpush3.msra.mxu0 %v523_v36  ;;  %p1272_p12 = scmp.lt.s32.totalorder %s1270_s26, %s1264_s22 }
  0x39   : > { %1127 = vmatprep.subr.mxu0 %v522_v38 }
  0x3a   : > { %1128 = vmatpush3.msra.mxu0 %v522_v38  ;;  %p1273_p13 = por %p1272_p12, %p1271_p11 }
  0x3b   : > { %1149 = vmatprep.subr.msk.mxu0 %vm293_vm0, %v728_v39 }
  0x3c   : > { %p1274_p0 = pnand %p1273_p13, %p1267_p10 }
  0xa5   : > { %v401_v40 = vpop.permute.xlu0 %400 }
  0xa9   : > { %v403_v43 = vpop.permute.xlu0 %402 }
  0xec   : > { %v1097_v42 = vpop.f32.mrf.mxu0 }
  0xed   : > { %v369_v44 = vadd.f32 %v1097_v42, %v1019_v41 }
  0xee   : > { %v363_v45 = vpop.f32.mrf.mxu0 }
  0xef   : > { %v1486_v46 = vsel %vm406_vm6, %v369_v44, %v403_v43  ;;  %v364_v47 = vadd.f32 %v1019_v41, %v363_v45 }
  0xf0   : > { %v512_v50 = vrot.slane %v1486_v46, 6  ;;  %v616_v51 = vrot.slane %v1486_v46, 7  ;;  %v716_v0 = vrot.slane %v1486_v46, 1  ;;  %v816_v15 = vrot.slane %v1486_v46, 2 }
  0xf1   : > { %v1488_v48 = vsel %vm406_vm6, %v364_v47, %v401_v40 }
  0xf2   : > { %1112 = vmatprep.mubr.msk.f32.mxu1 %vm418_vm7, %v1488_v48  ;;  %v511_v53 = vrot.slane %v1488_v48, 6  ;;  %v615_v54 = vrot.slane %v1488_v48, 7  ;;  %v715_v60 = vrot.slane %v1488_v48, 1  ;;  %v815_v12 = vrot.slane %v1488_v48, 2 }
  0xf3   : > { %1113 = vmatmul.mubr.msk.f32.vlgmr.msra.gmra.mxu1 %vm418_vm7, %v1486_v46 }
  0xf4   : > { %1133 = vmatpush3.msk.msra.mxu1 %vm293_vm0, %v628_v37  ;;  %v515_v55 = vsel %vm513_vm9, %v512_v50, %v511_v53  ;;  %v618_v57 = vsel %vm374_vm2, %v616_v51, %v615_v54  ;;  %v514_v62 = vsel %vm513_vm9, %v511_v53, %v512_v50  ;;  %v717_v2 = vsel %vm385_vm4, %v715_v60, %v716_v0 }
  0xf5   : > { %1134 = vmatprep.subr.mxu1 %v627_v52  ;;  %v520_v58 = vsel %vm1492_vm8, %v515_v55, 0.0  ;;  %v619_v59 = vsel %vm1450_vm3, %v618_v57, 0.0  ;;  %v617_v14 = vsel %vm374_vm2, %v615_v54, %v616_v51  ;;  %v818_v19 = vsel %vm817_vm10, %v815_v12, %v816_v15 }
  0xf6   : > { %1135 = vmatpush3.msra.mxu1 %v627_v52  ;;  %1129 = vmatprep.mubr.msk.f32.mxu0 %vm418_vm7, %v520_v58  ;;  %v718_v20 = vsel %vm385_vm4, %v716_v0, %v715_v60  ;;  %v819_v17 = vsel %vm817_vm10, %v816_v15, %v815_v12 }
  0xf7   : > { %1136 = vmatprep.subr.mxu1 %v626_v56  ;;  %1146 = vmatprep.mubr.msk.f32.mxu1 %vm418_vm7, %v619_v59  ;;  %v720_v22 = vsel %vm1464_vm5, %v718_v20, 0.0  ;;  %v825_v27 = vsel %vm277_vm11, %v819_v17, 0.0 }
  0xf8   : > { %1130 = vmatmul.mubr.msk.f32.vlgmr.msra.gmra.mxu0 %vm418_vm7, %v514_v62  ;;  %1137 = vmatpush3.msra.mxu1 %v626_v56 }
  0xf9   : > { %1150 = vmatpush3.msk.msra.mxu0 %vm293_vm0, %v728_v39  ;;  %1138 = vmatprep.subr.mxu1 %v625_v61 }
  0xfa   : > { %1151 = vmatprep.subr.mxu0 %v727_v63  ;;  %1163 = vmatprep.mubr.msk.f32.mxu0 %vm418_vm7, %v717_v2 }
  0xfb   : > { %1139 = vmatpush3.msra.mxu1 %v625_v61  ;;  %1152 = vmatpush3.msra.mxu0 %v727_v63 }
  0xfc   : > { %1140 = vmatprep.subr.mxu1 %v624_v5  ;;  %1153 = vmatprep.subr.mxu0 %v726_v6 }
  0xfd   : > { %1141 = vmatpush3.msra.mxu1 %v624_v5  ;;  %1154 = vmatpush3.msra.mxu0 %v726_v6 }
  0xfe   : > { %1142 = vmatprep.subr.mxu1 %v623_v7  ;;  %1155 = vmatprep.subr.mxu0 %v725_v8 }
  0xff   : > { %1143 = vmatpush3.msra.mxu1 %v623_v7  ;;  %1156 = vmatpush3.msra.mxu0 %v725_v8 }
 0x100   : > { %1144 = vmatprep.subr.mxu1 %v622_v9  ;;  %1157 = vmatprep.subr.mxu0 %v724_v10 }
 0x101   : > { %1145 = vmatpush3.msra.mxu1 %v622_v9  ;;  %1158 = vmatpush3.msra.mxu0 %v724_v10 }
 0x102   : > { %1147 = vmatmul.mubr.msk.f32.vlgmr.msra.gmra.mxu1 %vm418_vm7, %v617_v14  ;;  %1159 = vmatprep.subr.mxu0 %v723_v11 }
 0x103   : > { %1166 = vmatprep.subr.msk.mxu1 %vm293_vm0, %v833_v13  ;;  %1160 = vmatpush3.msra.mxu0 %v723_v11 }
 0x104   : > { %1167 = vmatpush3.msk.msra.mxu1 %vm293_vm0, %v833_v13  ;;  %1180 = vmatprep.mubr.msk.f32.mxu1 %vm418_vm7, %v818_v19 }
 0x105   : > { %1161 = vmatprep.subr.mxu0 %v722_v16  ;;  %1168 = vmatprep.subr.mxu1 %v832_v18 }
 0x106   : > { %1162 = vmatpush3.msra.mxu0 %v722_v16  ;;  %1169 = vmatpush3.msra.mxu1 %v832_v18 }
 0x107   : > { %1164 = vmatmul.mubr.msk.f32.vlgmr.msra.gmra.mxu0 %vm418_vm7, %v720_v22  ;;  %1170 = vmatprep.subr.mxu1 %v831_v21 }
 0x108   : > { %1171 = vmatpush3.msra.mxu1 %v831_v21 }
 0x109   : > { %1172 = vmatprep.subr.mxu1 %v830_v23 }
 0x10a   : > { %1173 = vmatpush3.msra.mxu1 %v830_v23 }
 0x10b   : > { %1174 = vmatprep.subr.mxu1 %v829_v24 }
 0x10c   : > { %1175 = vmatpush3.msra.mxu1 %v829_v24 }
 0x10d   : > { %1176 = vmatprep.subr.mxu1 %v828_v25 }
 0x10e   : > { %1177 = vmatpush3.msra.mxu1 %v828_v25 }
 0x10f   : > { %1178 = vmatprep.subr.mxu1 %v827_v26 }
 0x110   : > { %1179 = vmatpush3.msra.mxu1 %v827_v26 }
 0x111   : > { %1181 = vmatmul.mubr.msk.f32.vlgmr.msra.gmra.mxu1 %vm418_vm7, %v825_v27 }
 0x1b3   : > { %v1114_v28 = vpop.f32.mrf.mxu1 }
 0x1b4   : > { %v510_v32 = vadd.f32 %v1114_v28, %v1026_v30 }
 0x1b5   : > { %v494_v31 = vpop.f32.mrf.mxu1 }
 0x1b6   : > { %v509_v33 = vadd.f32 %v1026_v30, %v494_v31 }
 0x1b8   : > { %v1131_v29 = vpop.f32.mrf.mxu0 }
 0x1b9   : > { %v614_v34 = vadd.f32 %v1131_v29, %v510_v32 }
 0x1ba   : > { %v604_v3 = vpop.f32.mrf.mxu0 }
 0x1bb   : > { %v613_v36 = vadd.f32 %v604_v3, %v509_v33 }
 0x1c2   : > { %v1148_v4 = vpop.f32.mrf.mxu1 }
 0x1c3   : > { %v714_v37 = vadd.f32 %v1148_v4, %v614_v34 }
 0x1c4   : > { %v704_v35 = vpop.f32.mrf.mxu1 }
 0x1c5   : > { %v713_v39 = vadd.f32 %v704_v35, %v613_v36 }
 0x1c7   : > { %v1165_v1 = vpop.f32.mrf.mxu0 }
 0x1c8   : > { %v814_v40 = vadd.f32 %v1165_v1, %v714_v37 }
 0x1c9   : > { %v804_v38 = vpop.f32.mrf.mxu0 }
 0x1ca   : > { %v813_v42 = vadd.f32 %v804_v38, %v713_v39 }
 0x1d1   : > { %v1182_v41 = vpop.f32.mrf.mxu1 }
 0x1d2   : > { %v919_v43 = vadd.f32 %v1182_v41, %v814_v40 }
 0x1d3   : > { %v909_v44 = vpop.f32.mrf.mxu1 }
 0x1d4   : > { %921 = vst [vmem:[%s233_s11 + $0x8] sm:$0xff] %v919_v43  ;;  %v918_v45 = vadd.f32 %v909_v44, %v813_v42 }
 0x1d6   : > { %920 = vst [vmem:[%s233_s11] sm:$0xff] %v918_v45 }
 0x1d7   : > { %1277 = shalt.err (!%p1274_p0)
}
 0x1d8   : > { %s1278_s30 = scalar_lea.hbm %s1556_s16, 256  ;;  %s1282_s8 = scalar_lea.hbm %s1603_s5, 512 }
 0x1d9   : > { %p1279_p1 = scmp.ne.s32.totalorder %s1556_s16, %s1278_s30  ;;  %p1283_p4 = scmp.lt.s32.totalorder %s1556_s16, %s1603_s5 }
 0x1da   : > { %p1284_p7 = scmp.lt.s32.totalorder %s1282_s8, %s1278_s30 }
 0x1db   : > { %p1280_p2 = pnand %p1279_p1, %p1405_p5 }
 0x1dc   : > { %p1285_p6 = por %p1284_p7, %p1283_p4 }
 0x1dd   : > { %p1281_p3 = pneg %p1280_p2 }
 0x1df   : > { %p1286_p8 = pnand %p1285_p6, %p1281_p3 }
 0x1e1   : > { %1289 = shalt.err (!%p1286_p8)
}
 0x1e2   : > { %s1335_s11 = smov 128   ;;  %s1336_s13 = smov 8  }
 0x1e3   : > { %1187 = dma.vmem_to_hbm [thread:$0]  (%p1405_p5), %s1551_s12, 256, %s1556_s16, %s1558_s17, %s1335_s11, %s1335_s11, %s1336_s13  }
 0x1e4 PF: > { %p1199_p9 = scmp.ge.s32.totalorder %s1328_s21, 2  ;;  %s951_s14 = sand.u32 1, %s1316_s18  }
 0x1e5   : > { %p1613_p10 = scmp.ne.s32.totalorder %s1605_s29, 0  ;;  %s952_s15 = scalar_lea.sflag [#allocation4], %s951_s14 }
 0x1e7   : > { %p1194_p11 = pnand %p1199_p9, %p1613_p10 }
 0x1e9   : > { %p1195_p12 = pneg %p1194_p11 }
 0x1eb   : > { %1311 = dma.done.wait (%p1195_p12), %s952_s15, 256  }
 0x1ec   : > { %1313 = vsyncadd (%p1195_p12), %s952_s15, 4294967040  ;;  %p16_p13 = scmp.ge.s32.totalorder %s1392_s24, 4   ;;  %s1614_s18 = smov %s1320_s19 }
 0x1ed   : > { %s1615_s19 = smov %s1324_s20  ;;  %s1616_s20 = smov %s1403_s27 }
 0x1ee   : > { %s1617_s21 = smov %s1392_s24  ;;  %18 = sbr.rel (!%p16_p13) target bundleno = 4 (0x4), region = 84 }
 0x1f3   :  { %957 = vsyncpa [#allocation3], 1 }
 0x1f4   :  { %959 = vsyncpa [#allocation3 + $0x1], 1 }
 0x1f5   :  { %960 = vsyncpa [#allocation4], 1 }
 0x1f6   :  { %962 = vsyncpa [#allocation4 + $0x1], 1 }

</bundles_post_ra>
